<compile_context>
chip_gen: v7x
topology: tpu7x:2x2x1
jax: 0.10.0
libtpu: 0.0.40
codegen_flags: <defaults>
</compile_context>

<pallas_src>
import jax
import jax.numpy as jnp
from jax.experimental import pallas as pl
from jax.experimental.pallas import tpu as pltpu


def _bent_id_kernel(x_ref, o_ref):
    x = x_ref[...].astype(jnp.float32)
    o_ref[...] = (x + (jnp.sqrt(x * x + 1.0) - 1.0) * 0.5).astype(o_ref.dtype)


# Below this element count, launch overhead dominates -> plain jnp.
_MIN_PALLAS_ELEMS = 64 * 1024


def _chip_kind() -> str:
    try:
        return jax.devices()[0].device_kind.lower()
    except Exception:
        return ""


def _block_budget_bytes() -> int:
    """Per-block byte budget (double-buffered in + out => 4x this in VMEM)."""
    kind = _chip_kind()
    if ("v6" in kind) or ("v7" in kind) or ("7x" in kind):
        # v6e/v7x: 4 MiB blocks -> 16 MiB VMEM, fits the 32 MiB scoped default.
        return 4 * 1024 * 1024
    # v5e and older: 2 MiB blocks -> 8 MiB VMEM, under the 16 MiB scoped default.
    return 2 * 1024 * 1024


def _min_grid_blocks() -> int:
    """Minimum number of grid blocks so all TensorCores get work (v7x: 2 TCs)."""
    kind = _chip_kind()
    if ("v7" in kind) or ("7x" in kind):
        return 2
    return 1


def _row_tile(rows: int, lanes: int, itemsize: int, sublane: int) -> int:
    """Row tile: byte-budget-sized, sublane-aligned, split for multi-TC chips."""
    budget = _block_budget_bytes()
    target = max(sublane, (budget // (lanes * itemsize)) // sublane * sublane)

    min_blocks = _min_grid_blocks()
    if min_blocks > 1 and rows > sublane:
        # Cap the tile so the (parallel) grid has >= min_blocks steps.
        cap = max(sublane, pl.cdiv(pl.cdiv(rows, min_blocks), sublane) * sublane)
        target = min(target, cap)

    if rows % sublane == 0 or rows > target:
        # Multiple-of-sublane tile; Pallas masks the partial last block.
        return min(target, rows)
    # rows not a sublane multiple and fits in one tile: use the full dim
    # (block dim equal to the full array dim is always legal).
    return rows


def _bent_id_jnp(x: jax.Array) -> jax.Array:
    xf = x.astype(jnp.float32)
    return (xf + (jnp.sqrt(xf * xf + 1.0) - 1.0) * 0.5).astype(x.dtype)


def _bent_id_2d(x2d: jax.Array) -> jax.Array:
    """Run the Pallas kernel over a lane-dense (rows, lanes) slab."""
    rows, lanes = x2d.shape
    dtype = x2d.dtype
    itemsize = jnp.dtype(dtype).itemsize
    sublane = max(8, 32 // max(itemsize, 1))  # f32: 8, bf16/f16: 16, int8/fp8: 32
    tr = _row_tile(rows, lanes, itemsize, sublane)
    grid = (pl.cdiv(rows, tr),)

    n = rows * lanes
    cost = pl.CostEstimate(
        flops=5 * n, transcendentals=n, bytes_accessed=2 * n * itemsize
    )

    return pl.pallas_call(
        _bent_id_kernel,
        out_shape=jax.ShapeDtypeStruct((rows, lanes), dtype),
        grid_spec=pltpu.PrefetchScalarGridSpec(
            num_scalar_prefetch=0,
            grid=grid,
            in_specs=[pl.BlockSpec((tr, lanes), lambda i: (i, 0))],
            out_specs=pl.BlockSpec((tr, lanes), lambda i: (i, 0)),
        ),
        compiler_params=pltpu.CompilerParams(
            dimension_semantics=("parallel",),
        ),
        cost_estimate=cost,
    )(x2d)


def bent_id(x: jax.Array, *, min_pallas_elems: int = _MIN_PALLAS_ELEMS) -> jax.Array:
    """Applies the bent-identity activation elementwise."""
    n = x.size
    if n == 0 or n < min_pallas_elems:
        # Small-size bypass: XLA's fused elementwise is at roofline; the
        # custom-call launch overhead would dominate.
        return _bent_id_jnp(x)

    flat = x.reshape(-1)  # free for a contiguous array

    if n % 128 == 0:
        lanes = 1024 if n % 1024 == 0 else 128
        out = _bent_id_2d(flat.reshape(n // lanes, lanes))
        return out.reshape(x.shape)

    # Ragged: kernel on the 1024-aligned prefix, plain jnp on the small tail.
    m = (n // 1024) * 1024
    if m == 0:
        return _bent_id_jnp(x)
    head = _bent_id_2d(flat[:m].reshape(m // 1024, 1024)).reshape(-1)
    tail = _bent_id_jnp(flat[m:])
    return jnp.concatenate([head, tail]).reshape(x.shape)


def _ref(x):
    return x + (jnp.sqrt(x * x + 1.0) - 1.0) / 2.0


if __name__ == "__main__":
    key = jax.random.PRNGKey(0)
    k1, k2, k3, k4 = jax.random.split(key, 4)

    # Module-implied shape (NCHW). Small -> normally served by the jnp bypass;
    # also force the Pallas path once to prove the kernel compiles and runs.
    x = jax.random.normal(k1, (2, 4, 16, 16), dtype=jnp.float32)
    out = jax.block_until_ready(bent_id(x, min_pallas_elems=0))
    assert out.shape == x.shape and out.dtype == x.dtype
    assert jnp.max(jnp.abs(out - _ref(x))) < 1e-5
    out_bypass = jax.block_until_ready(bent_id(x))
    assert jnp.max(jnp.abs(out_bypass - _ref(x))) < 1e-5

    # Larger f32 tensor: real streaming path (multi-block grid on v7x).
    x2 = jax.random.normal(k2, (8, 32, 32, 32), dtype=jnp.float32)
    out2 = jax.block_until_ready(bent_id(x2))
    assert out2.shape == x2.shape
    assert jnp.max(jnp.abs(out2 - _ref(x2))) < 1e-5

    # bf16: byte-based tile sizing + 16-row sublane rounding.
    x3 = jax.random.normal(k3, (4, 64, 32, 32), dtype=jnp.bfloat16)
    out3 = jax.block_until_ready(bent_id(x3))
    ref3 = _ref(x3.astype(jnp.float32)).astype(jnp.bfloat16)
    assert out3.dtype == jnp.bfloat16
    assert jnp.max(jnp.abs(out3.astype(jnp.float32) - ref3.astype(jnp.float32))) < 2e-2

    # Ragged size (not a multiple of 128): kernel on the 1024-aligned prefix,
    # jnp on the tail.
    x4 = jax.random.normal(k4, (3, 7, 250), dtype=jnp.float32)
    out4 = jax.block_until_ready(bent_id(x4, min_pallas_elems=0))
    assert out4.shape == x4.shape
    assert jnp.max(jnp.abs(out4 - _ref(x4))) < 1e-5

    print("KERNEL_OK")
</pallas_src>

<mosaic_0001>
module attributes {stable_mosaic.version = 11 : i64} {
  func.func @_bent_id_kernel(%arg0: i32, %arg1: memref<2x1024xf32, #tpu.memory_space<vmem>>, %arg2: memref<2x1024xf32, #tpu.memory_space<vmem>>) attributes {dimension_semantics = [#tpu.dimension_semantics<parallel>], iteration_bounds = array<i64: 1>, scalar_prefetch = 0 : i64, scratch_operands = 0 : i64, tpu.core_type = #tpu.core_type<tc>, window_params = [{transform_indices = @transform_0, window_bounds = array<i64: 2, 1024>}, {transform_indices = @transform_1, window_bounds = array<i64: 2, 1024>}]} {
    %c0 = arith.constant 0 : index
    %c0_0 = arith.constant 0 : index
    %0 = vector.load %arg1[%c0, %c0_0] : memref<2x1024xf32, #tpu.memory_space<vmem>>, vector<2x1024xf32>
    %1 = arith.mulf %0, %0 : vector<2x1024xf32>
    %cst = arith.constant 1.000000e+00 : f32
    %2 = vector.broadcast %cst : f32 to vector<2x1024xf32>
    %3 = arith.addf %1, %2 : vector<2x1024xf32>
    %4 = math.sqrt %3 : vector<2x1024xf32>
    %cst_1 = arith.constant 1.000000e+00 : f32
    %5 = vector.broadcast %cst_1 : f32 to vector<2x1024xf32>
    %6 = arith.subf %4, %5 : vector<2x1024xf32>
    %cst_2 = arith.constant 5.000000e-01 : f32
    %7 = vector.broadcast %cst_2 : f32 to vector<2x1024xf32>
    %8 = arith.mulf %6, %7 : vector<2x1024xf32>
    %9 = arith.addf %0, %8 : vector<2x1024xf32>
    %c0_3 = arith.constant 0 : index
    %c0_4 = arith.constant 0 : index
    %10 = vector.load %arg2[%c0_3, %c0_4] : memref<2x1024xf32, #tpu.memory_space<vmem>>, vector<2x1024xf32>
    tpu.vector_store %arg2[%c0_3, %c0_4], %9 {strides = array<i32>} : memref<2x1024xf32, #tpu.memory_space<vmem>>, vector<2x1024xf32>,
    return
  }
  func.func @transform_0(%arg0: i32) -> (i32, i32) {
    %c0_i32 = arith.constant 0 : i32
    %c0_i32_0 = arith.constant 0 : i32
    return %arg0, %c0_i32 : i32, i32
  }
  func.func @transform_1(%arg0: i32) -> (i32, i32) {
    %c0_i32 = arith.constant 0 : i32
    %c0_i32_0 = arith.constant 0 : i32
    return %arg0, %c0_i32 : i32, i32
  }
}

</mosaic_0001>

<bundles_post_ra>
// kernel: tpu_custom_call.1
= control target key start
LH: loop header
LB: loop body
LE: loop exit
PB: predicated region body
PF: predicated region fallthrough
CT: control target
= control target key end

     0   :  { %6 = vsyncpa [#allocation3], 0  ;;  %s156_s0 = inlined_call_operand.hbm [shape: f32[2,1024], index: 0, kind: input, shape index: {}]   ;;  %s157_s1 = inlined_call_operand.hbm [shape: f32[2,1024], index: 1, kind: output, shape index: {}]  }
   0x1   :  { %7 = vsyncpa [#allocation4], 0  ;;  %s120_s6 = smov [#allocation2]   ;;  %s72_s10 = scalar_lea.hbm %s156_s0, 256 }
   0x2   :  { %s14_s7 = sshll.u32 %s120_s6, 4  ;;  %p73_p0 = scmp.ne.s32.totalorder %s156_s0, %s72_s10  ;;  %s15_s7 = int_to_ptr.vmem [resolvable:$true] %s14_s7 }
   0x3   :  { %p76_p1 = scmp.lt.u32.totalorder %s72_s10, %s156_s0 }
   0x5   :  { %p78_p2 = pnand %p76_p1, %p73_p0 }
   0x7   :  { %81 = shalt.err (!%p78_p2)
}
   0x8   :  { %s82_s15 = scalar_lea.vmem %s15_s7, 256  ;;  %p87_p4 = scmp.lt.s32.totalorder %s15_s7, %s15_s7 }
   0x9   :  { %p83_p3 = scmp.ne.s32.totalorder %s15_s7, %s82_s15  ;;  %p88_p5 = scmp.lt.s32.totalorder %s82_s15, %s82_s15 }
   0xb   :  { %p89_p6 = por %p88_p5, %p87_p4 }
   0xd   :  { %p90_p7 = pnand %p89_p6, %p83_p3 }
   0xf   :  { %93 = shalt.err (!%p90_p7)
}
  0x10   :  { %17 = dma.hbm_to_vmem [thread:$0]  %s156_s0, 256, %s15_s7, [#allocation3]  }
  0x11   :  { %116 = dma.done.wait [#allocation3], 256  }
  0x12   :  { %117 = vsyncadd [#allocation3], 4294967040  ;;  %v21_v0 = vld [vmem:[#allocation2] sm:$0xff]  ;;  %v22_v1 = vld [vmem:[#allocation2 + $0x8] sm:$0xff]  ;;  %s121_s0 = smov [#allocation5]  }
  0x13   :  { %v23_v2 = vmul.f32 %v21_v0, %v21_v0  ;;  %v24_v3 = vmul.f32 %v22_v1, %v22_v1  ;;  %s55_s18 = sshll.u32 %s121_s0, 4  ;;  %s56_s18 = int_to_ptr.vmem [resolvable:$true] %s55_s18 }
  0x14   :  { %s94_s19 = scalar_lea.vmem %s56_s18, 256  ;;  %p99_p9 = scmp.lt.s32.totalorder %s56_s18, %s56_s18 }
  0x15   :  { %v25_v4 = vadd.f32 1.0, %v23_v2  ;;  %v26_v5 = vadd.f32 1.0, %v24_v3  ;;  %p95_p8 = scmp.ne.s32.totalorder %s56_s18, %s94_s19  ;;  %p100_p10 = scmp.lt.s32.totalorder %s94_s19, %s94_s19 }
  0x17   :  { %68 = vrsqrt.f32 %v25_v4  ;;  %vm29_vm0 = vcmp.eq.f32.partialorder %v25_v4, inf  ;;  %v32_v7 = vand.u32 2147483648, %v25_v4  ;;  %vm31_vm1 = vcmp.eq.f32.partialorder %v25_v4, 0.0  ;;  %p101_p11 = por %p100_p10, %p99_p9 }
  0x18   :  { %70 = vrsqrt.f32 %v26_v5  ;;  %vm36_vm2 = vcmp.eq.f32.partialorder %v26_v5, inf  ;;  %v39_v10 = vand.u32 2147483648, %v26_v5  ;;  %vm38_vm3 = vcmp.eq.f32.partialorder %v26_v5, 0.0 }
  0x19   :  { %p102_p12 = pnand %p101_p11, %p95_p8 }
  0x21   :  { %v69_v6 = vpop.eup %68 }
  0x22   :  { %v71_v8 = vpop.eup %70  ;;  %v28_v9 = vmul.f32 %v69_v6, %v25_v4 }
  0x23   :  { %v35_v11 = vmul.f32 %v71_v8, %v26_v5 }
  0x24   :  { %v30_v12 = vsel %vm29_vm0, %v25_v4, %v28_v9 }
  0x25   :  { %v33_v13 = vsel %vm31_vm1, %v32_v7, %v30_v12  ;;  %v37_v14 = vsel %vm36_vm2, %v26_v5, %v35_v11 }
  0x26   :  { %v64_v15 = vadd.f32 -1.0, %v33_v13  ;;  %v40_v16 = vsel %vm38_vm3, %v39_v10, %v37_v14 }
  0x27   :  { %v65_v17 = vadd.f32 -1.0, %v40_v16 }
  0x28   :  { %v43_v18 = vmul.f32 0.5, %v64_v15 }
  0x29   :  { %v44_v19 = vmul.f32 0.5, %v65_v17 }
  0x2a   :  { %v45_v20 = vadd.f32 %v43_v18, %v21_v0 }
  0x2b   :  { %v46_v21 = vadd.f32 %v44_v19, %v22_v1 }
  0x2c   :  { %47 = vst [vmem:[#allocation5] sm:$0xff] %v45_v20 }
  0x2d   :  { %48 = vst [vmem:[#allocation5 + $0x8] sm:$0xff] %v46_v21 }
  0x2e   :  { %105 = shalt.err (!%p102_p12)
}
  0x2f   :  { %s106_s22 = scalar_lea.hbm %s157_s1, 256 }
  0x30   :  { %p107_p13 = scmp.ne.s32.totalorder %s157_s1, %s106_s22  ;;  %p110_p0 = scmp.lt.u32.totalorder %s106_s22, %s157_s1 }
  0x32   :  { %p112_p1 = pnand %p110_p0, %p107_p13 }
  0x34   :  { %115 = shalt.err (!%p112_p1)
}
  0x35   :  { %58 = dma.vmem_to_hbm [thread:$0]  %s56_s18, 256, %s157_s1, [#allocation4]  }
  0x36   :  { %118 = dma.done.wait [#allocation4], 256  }
  0x37   :  { %119 = vsyncadd [#allocation4], 4294967040 }
  0x38   :  { %62 = vsyncpa [#allocation3], 1 }
  0x39   :  { %63 = vsyncpa [#allocation4], 1 }

</bundles_post_ra>
